<compile_context>
chip_gen: v7x
topology: tpu7x:2x2x1
jax: 0.10.0
libtpu: 0.0.40
codegen_flags: <defaults>
</compile_context>

<pallas_src>
import functools

import jax
import jax.numpy as jnp
from jax.experimental import pallas as pl
from jax.experimental.pallas import tpu as pltpu

LANE = 128            # vreg lane width; all feature dims are padded to this
DEFAULT_BLOCK_B = 512  # batch rows per grid step


# ----------------------------- kernel bodies ------------------------------- #

def _mlp_body(x, w1, b1, w2, b2, w3, b3, w4, b4):
    """Forward math identical to the PyTorch module (weights pre-transposed)."""
    h = jnp.maximum(jnp.dot(x, w1, preferred_element_type=jnp.float32) + b1, 0.0)
    h = jnp.maximum(jnp.dot(h, w2, preferred_element_type=jnp.float32) + b2, 0.0) + h
    h = jnp.maximum(jnp.dot(h, w3, preferred_element_type=jnp.float32) + b3, 0.0) + h
    return jnp.dot(h, w4, preferred_element_type=jnp.float32) + b4


def mlp_kernel(x_ref, w1_ref, b1_ref, w2_ref, b2_ref, w3_ref, b3_ref,
               w4_ref, b4_ref, o_ref):
    o_ref[...] = _mlp_body(x_ref[...],
                           w1_ref[...], b1_ref[...],
                           w2_ref[...], b2_ref[...],
                           w3_ref[...], b3_ref[...],
                           w4_ref[...], b4_ref[...])


def mlp_argmax_kernel(action_size, x_ref, w1_ref, b1_ref, w2_ref, b2_ref,
                      w3_ref, b3_ref, w4_ref, b4_ref, a_ref):
    """Forward + fused argmax over actions: q-values never leave VMEM."""
    y = _mlp_body(x_ref[...],
                  w1_ref[...], b1_ref[...],
                  w2_ref[...], b2_ref[...],
                  w3_ref[...], b3_ref[...],
                  w4_ref[...], b4_ref[...])
    lane = jax.lax.broadcasted_iota(jnp.int32, y.shape, 1)
    # Mask out the zero-padded action columns before taking the max.
    y = jnp.where(lane < action_size, y, jnp.finfo(jnp.float32).min)
    m = jnp.max(y, axis=1, keepdims=True)
    # First index achieving the max (matches torch .max(1)[1] tie behavior).
    idx = jnp.where(y == m, lane.astype(jnp.float32), jnp.float32(LANE))
    a_ref[...] = jnp.min(idx, axis=1, keepdims=True).astype(jnp.int32)


# ----------------------------- call wrappers -------------------------------- #

def _flat_params(p):
    return (p["w1"], p["b1"], p["w2"], p["b2"],
            p["w3"], p["b3"], p["w4"], p["b4"])


def _in_specs(tb):
    x_spec = pl.BlockSpec((tb, LANE), lambda i: (i, 0))
    w_spec = pl.BlockSpec((LANE, LANE), lambda i: (0, 0))   # stays VMEM-resident
    b_spec = pl.BlockSpec((1, LANE), lambda i: (0, 0))
    return [x_spec, w_spec, b_spec, w_spec, b_spec, w_spec, b_spec, w_spec, b_spec]


def _pad_batch_and_lanes(x, tb):
    b, f = x.shape
    assert f <= LANE, "state_size must be <= 128 for this kernel"
    b_pad = pl.cdiv(b, tb) * tb
    return jnp.pad(x, ((0, b_pad - b), (0, LANE - f)))


@functools.partial(jax.jit, static_argnames=("action_size", "block_b"))
def mymodel_forward(x, padded_params, *, action_size, block_b=DEFAULT_BLOCK_B):
    """x: [B, state_size] f32. Returns q-values [B, action_size] f32."""
    B = x.shape[0]
    tb = B if B <= block_b else block_b
    xp = _pad_batch_and_lanes(x, tb)
    b_pad = xp.shape[0]
    out = pl.pallas_call(
        mlp_kernel,
        out_shape=jax.ShapeDtypeStruct((b_pad, LANE), jnp.float32),
        grid=(b_pad // tb,),
        in_specs=_in_specs(tb),
        out_specs=pl.BlockSpec((tb, LANE), lambda i: (i, 0)),
        compiler_params=pltpu.CompilerParams(
            dimension_semantics=("parallel",)),
    )(xp, *_flat_params(padded_params))
    return out[:B, :action_size]


@functools.partial(jax.jit, static_argnames=("action_size", "block_b"))
def mymodel_select_actions(x, padded_params, *, action_size,
                           block_b=DEFAULT_BLOCK_B):
    """Batched greedy actions: [B, 1] int32, argmax fused into the kernel."""
    B = x.shape[0]
    tb = B if B <= block_b else block_b
    xp = _pad_batch_and_lanes(x, tb)
    b_pad = xp.shape[0]
    acts = pl.pallas_call(
        functools.partial(mlp_argmax_kernel, action_size),
        out_shape=jax.ShapeDtypeStruct((b_pad, 1), jnp.int32),
        grid=(b_pad // tb,),
        in_specs=_in_specs(tb),
        out_specs=pl.BlockSpec((tb, 1), lambda i: (i, 0)),
        compiler_params=pltpu.CompilerParams(
            dimension_semantics=("parallel",)),
    )(xp, *_flat_params(padded_params))
    return acts[:B]


def select_action(state, padded_params, *, action_size):
    """Equivalent of MyModel.select_action: [1, 1] int32 greedy action."""
    return mymodel_select_actions(
        state, padded_params, action_size=action_size)[:1].reshape(1, 1)


# ----------------------------- parameters ----------------------------------- #

def init_params(key, state_size, action_size, hidden=32):
    """PyTorch nn.Linear-style init; weights stored as [in_features, out_features]."""
    dims = [(state_size, hidden), (hidden, hidden), (hidden, hidden),
            (hidden, action_size)]
    params = {}
    for i, (fin, fout) in enumerate(dims, start=1):
        key, kw, kb = jax.random.split(key, 3)
        bound = 1.0 / jnp.sqrt(jnp.float32(fin))
        params[f"w{i}"] = jax.random.uniform(kw, (fin, fout), jnp.float32, -bound, bound)
        params[f"b{i}"] = jax.random.uniform(kb, (1, fout), jnp.float32, -bound, bound)
    return params


def pad_params(params):
    """Zero-pad every weight to (128, 128) and bias to (1, 128), once, at setup."""
    padded = {}
    for i in range(1, 5):
        w = params[f"w{i}"]
        b = params[f"b{i}"]
        padded[f"w{i}"] = jnp.pad(w, ((0, LANE - w.shape[0]), (0, LANE - w.shape[1])))
        padded[f"b{i}"] = jnp.pad(b, ((0, 0), (0, LANE - b.shape[1])))
    return padded


# ----------------------------- main / checks -------------------------------- #

if __name__ == "__main__":
    state_size, action_size, batch = 8, 4, 2

    key = jax.random.PRNGKey(0)
    key, kx = jax.random.split(key)
    x = jax.random.normal(kx, (batch, state_size), jnp.float32)
    params = init_params(key, state_size, action_size)
    pparams = pad_params(params)

    # Small-batch forward (single grid step, full-array block).
    y = mymodel_forward(x, pparams, action_size=action_size)
    jax.block_until_ready(y)
    assert y.shape == (batch, action_size)

    # Pure-JAX reference (same math, unpadded params).
    def ref(x_, p):
        h = jnp.maximum(x_ @ p["w1"] + p["b1"], 0.0)
        h = jnp.maximum(h @ p["w2"] + p["b2"], 0.0) + h
        h = jnp.maximum(h @ p["w3"] + p["b3"], 0.0) + h
        return h @ p["w4"] + p["b4"]

    y_ref = ref(x, params)
    assert jnp.allclose(y, y_ref, atol=1e-5, rtol=1e-5), "forward mismatch vs reference"

    # select_action with fused in-kernel argmax (batch=1, PyTorch signature).
    a = select_action(x[:1], pparams, action_size=action_size)
    jax.block_until_ready(a)
    assert a.shape == (1, 1)
    assert int(a[0, 0]) == int(jnp.argmax(y_ref[0])), "fused argmax mismatch"

    # Larger batch: exercises the batch grid, padding to the block size,
    # weight residency across grid steps, and parallel batch semantics.
    key, kb = jax.random.split(key)
    xb = jax.random.normal(kb, (1030, state_size), jnp.float32)
    yb = mymodel_forward(xb, pparams, action_size=action_size)
    ab = mymodel_select_actions(xb, pparams, action_size=action_size)
    jax.block_until_ready((yb, ab))
    yb_ref = ref(xb, params)
    assert jnp.allclose(yb, yb_ref, atol=1e-4, rtol=1e-4), "batched forward mismatch"
    assert jnp.array_equal(ab[:, 0], jnp.argmax(yb_ref, axis=1).astype(jnp.int32)), \
        "batched fused argmax mismatch"

    print("KERNEL_OK")
</pallas_src>

<mosaic_0001>
module attributes {stable_mosaic.version = 11 : i64} {
  func.func @mlp_kernel(%arg0: i32, %arg1: memref<2x128xf32, #tpu.memory_space<vmem>>, %arg2: memref<128x128xf32, #tpu.memory_space<vmem>>, %arg3: memref<1x128xf32, #tpu.memory_space<vmem>>, %arg4: memref<128x128xf32, #tpu.memory_space<vmem>>, %arg5: memref<1x128xf32, #tpu.memory_space<vmem>>, %arg6: memref<128x128xf32, #tpu.memory_space<vmem>>, %arg7: memref<1x128xf32, #tpu.memory_space<vmem>>, %arg8: memref<128x128xf32, #tpu.memory_space<vmem>>, %arg9: memref<1x128xf32, #tpu.memory_space<vmem>>, %arg10: memref<2x128xf32, #tpu.memory_space<vmem>>) attributes {dimension_semantics = [#tpu.dimension_semantics<parallel>], iteration_bounds = array<i64: 1>, scalar_prefetch = 0 : i64, scratch_operands = 0 : i64, tpu.core_type = #tpu.core_type<tc>, window_params = [{transform_indices = @transform_0, window_bounds = array<i64: 2, 128>}, {pipeline_mode = #tpu.pipeline_mode<synchronous>, transform_indices = @transform_1, window_bounds = array<i64: 128, 128>}, {pipeline_mode = #tpu.pipeline_mode<synchronous>, transform_indices = @transform_2, window_bounds = array<i64: 1, 128>}, {pipeline_mode = #tpu.pipeline_mode<synchronous>, transform_indices = @transform_3, window_bounds = array<i64: 128, 128>}, {pipeline_mode = #tpu.pipeline_mode<synchronous>, transform_indices = @transform_4, window_bounds = array<i64: 1, 128>}, {pipeline_mode = #tpu.pipeline_mode<synchronous>, transform_indices = @transform_5, window_bounds = array<i64: 128, 128>}, {pipeline_mode = #tpu.pipeline_mode<synchronous>, transform_indices = @transform_6, window_bounds = array<i64: 1, 128>}, {pipeline_mode = #tpu.pipeline_mode<synchronous>, transform_indices = @transform_7, window_bounds = array<i64: 128, 128>}, {pipeline_mode = #tpu.pipeline_mode<synchronous>, transform_indices = @transform_8, window_bounds = array<i64: 1, 128>}, {transform_indices = @transform_9, window_bounds = array<i64: 2, 128>}]} {
    %c0 = arith.constant 0 : index
    %c0_0 = arith.constant 0 : index
    %0 = vector.load %arg1[%c0, %c0_0] : memref<2x128xf32, #tpu.memory_space<vmem>>, vector<2x128xf32>
    %c0_1 = arith.constant 0 : index
    %c0_2 = arith.constant 0 : index
    %1 = vector.load %arg2[%c0_1, %c0_2] : memref<128x128xf32, #tpu.memory_space<vmem>>, vector<128x128xf32>
    %c0_3 = arith.constant 0 : index
    %c0_4 = arith.constant 0 : index
    %2 = vector.load %arg3[%c0_3, %c0_4] : memref<1x128xf32, #tpu.memory_space<vmem>>, vector<1x128xf32>
    %c0_5 = arith.constant 0 : index
    %c0_6 = arith.constant 0 : index
    %3 = vector.load %arg4[%c0_5, %c0_6] : memref<128x128xf32, #tpu.memory_space<vmem>>, vector<128x128xf32>
    %c0_7 = arith.constant 0 : index
    %c0_8 = arith.constant 0 : index
    %4 = vector.load %arg5[%c0_7, %c0_8] : memref<1x128xf32, #tpu.memory_space<vmem>>, vector<1x128xf32>
    %c0_9 = arith.constant 0 : index
    %c0_10 = arith.constant 0 : index
    %5 = vector.load %arg6[%c0_9, %c0_10] : memref<128x128xf32, #tpu.memory_space<vmem>>, vector<128x128xf32>
    %c0_11 = arith.constant 0 : index
    %c0_12 = arith.constant 0 : index
    %6 = vector.load %arg7[%c0_11, %c0_12] : memref<1x128xf32, #tpu.memory_space<vmem>>, vector<1x128xf32>
    %c0_13 = arith.constant 0 : index
    %c0_14 = arith.constant 0 : index
    %7 = vector.load %arg8[%c0_13, %c0_14] : memref<128x128xf32, #tpu.memory_space<vmem>>, vector<128x128xf32>
    %c0_15 = arith.constant 0 : index
    %c0_16 = arith.constant 0 : index
    %8 = vector.load %arg9[%c0_15, %c0_16] : memref<1x128xf32, #tpu.memory_space<vmem>>, vector<1x128xf32>
    %cst = arith.constant dense<0.000000e+00> : vector<2x128xf32>
    %9 = tpu.matmul %0, %1, %cst {dimension_numbers = #tpu.dot_dimension_numbers<[1], [0], [0], [1], [0, 0, 1, 1], [], []>} : vector<2x128xf32>, vector<128x128xf32>, vector<2x128xf32> -> vector<2x128xf32>
    %10 = vector.broadcast %2 : vector<1x128xf32> to vector<2x128xf32>
    %11 = arith.addf %9, %10 : vector<2x128xf32>
    %cst_17 = arith.constant 0.000000e+00 : f32
    %12 = vector.broadcast %cst_17 : f32 to vector<2x128xf32>
    %13 = arith.maximumf %11, %12 : vector<2x128xf32>
    %cst_18 = arith.constant dense<0.000000e+00> : vector<2x128xf32>
    %14 = tpu.matmul %13, %3, %cst_18 {dimension_numbers = #tpu.dot_dimension_numbers<[1], [0], [0], [1], [0, 0, 1, 1], [], []>} : vector<2x128xf32>, vector<128x128xf32>, vector<2x128xf32> -> vector<2x128xf32>
    %15 = vector.broadcast %4 : vector<1x128xf32> to vector<2x128xf32>
    %16 = arith.addf %14, %15 : vector<2x128xf32>
    %cst_19 = arith.constant 0.000000e+00 : f32
    %17 = vector.broadcast %cst_19 : f32 to vector<2x128xf32>
    %18 = arith.maximumf %16, %17 : vector<2x128xf32>
    %19 = arith.addf %18, %13 : vector<2x128xf32>
    %cst_20 = arith.constant dense<0.000000e+00> : vector<2x128xf32>
    %20 = tpu.matmul %19, %5, %cst_20 {dimension_numbers = #tpu.dot_dimension_numbers<[1], [0], [0], [1], [0, 0, 1, 1], [], []>} : vector<2x128xf32>, vector<128x128xf32>, vector<2x128xf32> -> vector<2x128xf32>
    %21 = vector.broadcast %6 : vector<1x128xf32> to vector<2x128xf32>
    %22 = arith.addf %20, %21 : vector<2x128xf32>
    %cst_21 = arith.constant 0.000000e+00 : f32
    %23 = vector.broadcast %cst_21 : f32 to vector<2x128xf32>
    %24 = arith.maximumf %22, %23 : vector<2x128xf32>
    %25 = arith.addf %24, %19 : vector<2x128xf32>
    %cst_22 = arith.constant dense<0.000000e+00> : vector<2x128xf32>
    %26 = tpu.matmul %25, %7, %cst_22 {dimension_numbers = #tpu.dot_dimension_numbers<[1], [0], [0], [1], [0, 0, 1, 1], [], []>} : vector<2x128xf32>, vector<128x128xf32>, vector<2x128xf32> -> vector<2x128xf32>
    %27 = vector.broadcast %8 : vector<1x128xf32> to vector<2x128xf32>
    %28 = arith.addf %26, %27 : vector<2x128xf32>
    %c0_23 = arith.constant 0 : index
    %c0_24 = arith.constant 0 : index
    %29 = vector.load %arg10[%c0_23, %c0_24] : memref<2x128xf32, #tpu.memory_space<vmem>>, vector<2x128xf32>
    tpu.vector_store %arg10[%c0_23, %c0_24], %28 {strides = array<i32>} : memref<2x128xf32, #tpu.memory_space<vmem>>, vector<2x128xf32>,
    return
  }
  func.func @transform_0(%arg0: i32) -> (i32, i32) {
    %c0_i32 = arith.constant 0 : i32
    %c0_i32_0 = arith.constant 0 : i32
    return %arg0, %c0_i32 : i32, i32
  }
  func.func @transform_1(%arg0: i32) -> (i32, i32) {
    %c0_i32 = arith.constant 0 : i32
    %c0_i32_0 = arith.constant 0 : i32
    %c0_i32_1 = arith.constant 0 : i32
    return %c0_i32, %c0_i32_0 : i32, i32
  }
  func.func @transform_2(%arg0: i32) -> (i32, i32) {
    %c0_i32 = arith.constant 0 : i32
    %c0_i32_0 = arith.constant 0 : i32
    %c0_i32_1 = arith.constant 0 : i32
    return %c0_i32, %c0_i32_0 : i32, i32
  }
  func.func @transform_3(%arg0: i32) -> (i32, i32) {
    %c0_i32 = arith.constant 0 : i32
    %c0_i32_0 = arith.constant 0 : i32
    %c0_i32_1 = arith.constant 0 : i32
    return %c0_i32, %c0_i32_0 : i32, i32
  }
  func.func @transform_4(%arg0: i32) -> (i32, i32) {
    %c0_i32 = arith.constant 0 : i32
    %c0_i32_0 = arith.constant 0 : i32
    %c0_i32_1 = arith.constant 0 : i32
    return %c0_i32, %c0_i32_0 : i32, i32
  }
  func.func @transform_5(%arg0: i32) -> (i32, i32) {
    %c0_i32 = arith.constant 0 : i32
    %c0_i32_0 = arith.constant 0 : i32
    %c0_i32_1 = arith.constant 0 : i32
    return %c0_i32, %c0_i32_0 : i32, i32
  }
  func.func @transform_6(%arg0: i32) -> (i32, i32) {
    %c0_i32 = arith.constant 0 : i32
    %c0_i32_0 = arith.constant 0 : i32
    %c0_i32_1 = arith.constant 0 : i32
    return %c0_i32, %c0_i32_0 : i32, i32
  }
  func.func @transform_7(%arg0: i32) -> (i32, i32) {
    %c0_i32 = arith.constant 0 : i32
    %c0_i32_0 = arith.constant 0 : i32
    %c0_i32_1 = arith.constant 0 : i32
    return %c0_i32, %c0_i32_0 : i32, i32
  }
  func.func @transform_8(%arg0: i32) -> (i32, i32) {
    %c0_i32 = arith.constant 0 : i32
    %c0_i32_0 = arith.constant 0 : i32
    %c0_i32_1 = arith.constant 0 : i32
    return %c0_i32, %c0_i32_0 : i32, i32
  }
  func.func @transform_9(%arg0: i32) -> (i32, i32) {
    %c0_i32 = arith.constant 0 : i32
    %c0_i32_0 = arith.constant 0 : i32
    return %arg0, %c0_i32 : i32, i32
  }
}

</mosaic_0001>

<bundles_post_ra>
// kernel: mymodel_forward.1
= control target key start
LH: loop header
LB: loop body
LE: loop exit
PB: predicated region body
PF: predicated region fallthrough
CT: control target
= control target key end

     0   :  { %14 = vsyncpa [#allocation3], 0  ;;  %s1121_s0 = inlined_call_operand.vmem [shape: f32[2,128], index: 0, kind: input, shape index: {}]   ;;  %s1122_s1 = inlined_call_operand.hbm [shape: f32[128,128], index: 1, kind: input, shape index: {}]   ;;  %s1123_s2 = inlined_call_operand.vmem [shape: f32[1,128], index: 2, kind: input, shape index: {}]   ;;  %s1124_s3 = inlined_call_operand.hbm [shape: f32[128,128], index: 3, kind: input, shape index: {}]   ;;  %s1125_s4 = inlined_call_operand.vmem [shape: f32[1,128], index: 4, kind: input, shape index: {}]   ;;  %s1126_s5 = inlined_call_operand.hbm [shape: f32[128,128], index: 5, kind: input, shape index: {}]   ;;  %s1127_s6 = inlined_call_operand.vmem [shape: f32[1,128], index: 6, kind: input, shape index: {}]   ;;  %s1128_s7 = inlined_call_operand.hbm [shape: f32[128,128], index: 7, kind: input, shape index: {}]   ;;  %s1129_s8 = inlined_call_operand.vmem [shape: f32[1,128], index: 8, kind: input, shape index: {}]   ;;  %s1130_s9 = inlined_call_operand.hbm [shape: f32[2,128], index: 9, kind: output, shape index: {}]  }
   0x1   :  { %15 = vsyncpa [#allocation6], 0 }
   0x2   :  { %16 = vsyncpa [#allocation9], 0 }
   0x3   :  { %17 = vsyncpa [#allocation4], 0  ;;  %s920_s30 = smov [#allocation5]   ;;  %s921_s11 = smov [#allocation2]  }
   0x4   :  { %s39_s10 = sshll.u32 %s920_s30, 4  ;;  %s25_s12 = sshll.u32 %s921_s11, 4  ;;  %s40_s10 = int_to_ptr.vmem [resolvable:$true] %s39_s10  ;;  %s980_s12 = int_to_ptr.vmem [resolvable:$true] %s25_s12 }
   0x5   :  { %s802_s15 = scalar_lea.hbm %s1124_s3, 2048 }
   0x6   :  { %p803_p0 = scmp.ne.s32.totalorder %s1124_s3, %s802_s15  ;;  %p806_p1 = scmp.lt.u32.totalorder %s802_s15, %s1124_s3 }
   0x8   :  { %p808_p2 = pnand %p806_p1, %p803_p0 }
   0xa   :  { %811 = shalt.err (!%p808_p2)
}
   0xb   :  { %s812_s20 = scalar_lea.vmem %s40_s10, 2048  ;;  %p817_p4 = scmp.lt.s32.totalorder %s40_s10, %s40_s10 }
   0xc   :  { %p813_p3 = scmp.ne.s32.totalorder %s40_s10, %s812_s20  ;;  %p818_p5 = scmp.lt.s32.totalorder %s812_s20, %s812_s20 }
   0xe   :  { %p819_p6 = por %p818_p5, %p817_p4 }
  0x10   :  { %p820_p7 = pnand %p819_p6, %p813_p3 }
  0x12   :  { %823 = shalt.err (!%p820_p7)
}
  0x13   :  { %s922_s21 = smov 128   ;;  %s923_s22 = smov 8  }
  0x14   :  { %45 = dma.hbm_to_vmem [thread:$0]  %s1124_s3, 2048, %s40_s10, [#allocation6], %s922_s21, %s922_s21, %s923_s22  }
  0x15   :  { %s824_s27 = scalar_lea.hbm %s1122_s1, 2048 }
  0x16   :  { %p825_p8 = scmp.ne.s32.totalorder %s1122_s1, %s824_s27  ;;  %p828_p9 = scmp.lt.u32.totalorder %s824_s27, %s1122_s1 }
  0x18   :  { %p830_p10 = pnand %p828_p9, %p825_p8 }
  0x1a   :  { %833 = shalt.err (!%p830_p10)
}
  0x1b   :  { %s834_s13 = scalar_lea.vmem %s980_s12, 2048  ;;  %p839_p12 = scmp.lt.s32.totalorder %s980_s12, %s980_s12 }
  0x1c   :  { %p835_p11 = scmp.ne.s32.totalorder %s980_s12, %s834_s13  ;;  %p840_p13 = scmp.lt.s32.totalorder %s834_s13, %s834_s13 }
  0x1e   :  { %p841_p0 = por %p840_p13, %p839_p12 }
  0x20   :  { %p842_p1 = pnand %p841_p0, %p835_p11 }
  0x22   :  { %845 = shalt.err (!%p842_p1)
}
  0x23   :  { %31 = dma.hbm_to_vmem [thread:$0]  %s1122_s1, 2048, %s980_s12, [#allocation3], %s922_s21, %s922_s21, %s923_s22  }
  0x24   :  { %s924_s14 = smov [#allocation7]   ;;  %s925_s16 = smov [#allocation8]  }
  0x25   :  { %s53_s15 = sshll.u32 %s924_s14, 4  ;;  %s67_s17 = sshll.u32 %s925_s16, 4  ;;  %s54_s15 = int_to_ptr.vmem [resolvable:$true] %s53_s15  ;;  %s1017_s17 = int_to_ptr.vmem [resolvable:$true] %s67_s17 }
  0x26   :  { %s846_s20 = scalar_lea.hbm %s1126_s5, 2048 }
  0x27   :  { %p847_p2 = scmp.ne.s32.totalorder %s1126_s5, %s846_s20  ;;  %p850_p3 = scmp.lt.u32.totalorder %s846_s20, %s1126_s5 }
  0x29   :  { %p852_p4 = pnand %p850_p3, %p847_p2 }
  0x2b   :  { %855 = shalt.err (!%p852_p4)
}
  0x2c   :  { %s856_s1 = scalar_lea.vmem %s54_s15, 2048  ;;  %p861_p6 = scmp.lt.s32.totalorder %s54_s15, %s54_s15 }
  0x2d   :  { %p857_p5 = scmp.ne.s32.totalorder %s54_s15, %s856_s1  ;;  %p862_p7 = scmp.lt.s32.totalorder %s856_s1, %s856_s1 }
  0x2f   :  { %p863_p8 = por %p862_p7, %p861_p6 }
  0x31   :  { %p864_p9 = pnand %p863_p8, %p857_p5 }
  0x33   :  { %867 = shalt.err (!%p864_p9)
}
  0x34   :  { %59 = dma.hbm_to_vmem [thread:$0]  %s1126_s5, 2048, %s54_s15, [#allocation6], %s922_s21, %s922_s21, %s923_s22  }
  0x35   :  { %s868_s30 = scalar_lea.hbm %s1128_s7, 2048 }
  0x36   :  { %p869_p10 = scmp.ne.s32.totalorder %s1128_s7, %s868_s30  ;;  %p872_p11 = scmp.lt.u32.totalorder %s868_s30, %s1128_s7 }
  0x38   :  { %p874_p12 = pnand %p872_p11, %p869_p10 }
  0x3a   :  { %877 = shalt.err (!%p874_p12)
}
  0x3b   :  { %s878_s14 = scalar_lea.vmem %s1017_s17, 2048  ;;  %p883_p0 = scmp.lt.s32.totalorder %s1017_s17, %s1017_s17 }
  0x3c   :  { %p879_p13 = scmp.ne.s32.totalorder %s1017_s17, %s878_s14  ;;  %p884_p1 = scmp.lt.s32.totalorder %s878_s14, %s878_s14 }
  0x3e   :  { %p885_p2 = por %p884_p1, %p883_p0 }
  0x40   :  { %p886_p3 = pnand %p885_p2, %p879_p13 }
  0x42   :  { %889 = shalt.err (!%p886_p3)
}
  0x43   :  { %73 = dma.hbm_to_vmem [thread:$0]  %s1128_s7, 2048, %s1017_s17, [#allocation9], %s922_s21, %s922_s21, %s923_s22  }
  0x44   :  { %912 = dma.done.wait [#allocation3], 2048  }
  0x45   :  { %913 = vsyncadd [#allocation3], 4294965248 }
  0x46   :  { %914 = dma.done.wait [#allocation6], 4096  }
  0x47   :  { %915 = vsyncadd [#allocation6], 4294963200 }
  0x48   :  { %916 = dma.done.wait [#allocation9], 2048  }
  0x49   :  { %917 = vsyncadd [#allocation9], 4294965248  ;;  %v926_v0 = vmov 0.0|0.0   ;;  %vm927_vm0 = vmmov 0   ;;  %v928_v1 = vmov 0.0   ;;  %v89_v2 = vld [vmem:[#allocation2] sm:$0xff] }
  0x4a   :  { %696 = vmatprep.subr.bf16.mxu0 %v926_v0  ;;  %588 = vmatprep.mubr.msk.f32.mxu0 %vm927_vm0, %v928_v1  ;;  %v90_v3 = vld [vmem:[#allocation2 + $0x8] sm:$0xff]  ;;  %v91_v4 = vld [vmem:[#allocation2 + $0x10] sm:$0xff]  ;;  %v92_v6 = vld [vmem:[#allocation2 + $0x18] sm:$0xff]  ;;  %s929_s20 = smov [#allocation10]  }
  0x4b   :  { %720 = vmatprep.subr.bf16.mxu1 %v926_v0  ;;  %623 = vmatprep.mubr.msk.f32.mxu1 %vm927_vm0, %v928_v1  ;;  %v697_v5 = vpack.c.bf16 %v90_v3, %v89_v2  ;;  %v700_v7 = vpack.c.bf16 %v92_v6, %v91_v4  ;;  %v93_v8 = vld [vmem:[#allocation2 + $0x20] sm:$0xff]  ;;  %v94_v9 = vld [vmem:[#allocation2 + $0x28] sm:$0xff]  ;;  %v108_v12 = vld [vmem:[#allocation5 + $0x10] sm:$0xff]  ;;  %s473_s23 = sshll.u32 %s929_s20, 4  ;;  %s474_s23 = int_to_ptr.vmem [resolvable:$true] %s473_s23 }
  0x4c   :  { %v106_v10 = vld [vmem:[#allocation5] sm:$0xff]  ;;  %v107_v11 = vld [vmem:[#allocation5 + $0x8] sm:$0xff]  ;;  %v109_v13 = vld [vmem:[#allocation5 + $0x18] sm:$0xff]  ;;  %v703_v14 = vpack.c.bf16 %v94_v9, %v93_v8  ;;  %s890_s24 = scalar_lea.vmem %s474_s23, 32  ;;  %p895_p5 = scmp.lt.s32.totalorder %s474_s23, %s474_s23 }
  0x4d   :  { %698 = vmatpush3.bf16.msra.mxu0 %v697_v5  ;;  %v721_v15 = vpack.c.bf16 %v107_v11, %v106_v10  ;;  %v95_v16 = vld [vmem:[#allocation2 + $0x30] sm:$0xff]  ;;  %v96_v17 = vld [vmem:[#allocation2 + $0x38] sm:$0xff]  ;;  %v724_v18 = vpack.c.bf16 %v109_v13, %v108_v12  ;;  %v110_v19 = vld [vmem:[#allocation5 + $0x20] sm:$0xff]  ;;  %p891_p4 = scmp.ne.s32.totalorder %s474_s23, %s890_s24  ;;  %p896_p6 = scmp.lt.s32.totalorder %s890_s24, %s890_s24 }
  0x4e   :  { %699 = vmatprep.subr.bf16.mxu0 %v926_v0  ;;  %v111_v20 = vld [vmem:[#allocation5 + $0x28] sm:$0xff]  ;;  %v706_v21 = vpack.c.bf16 %v96_v17, %v95_v16  ;;  %v97_v22 = vld [vmem:[#allocation2 + $0x40] sm:$0xff]  ;;  %v112_v25 = vld [vmem:[#allocation5 + $0x30] sm:$0xff] }
  0x4f   :  { %722 = vmatpush3.bf16.msra.mxu1 %v721_v15  ;;  %v98_v23 = vld [vmem:[#allocation2 + $0x48] sm:$0xff]  ;;  %v727_v24 = vpack.c.bf16 %v111_v20, %v110_v19  ;;  %v113_v26 = vld [vmem:[#allocation5 + $0x38] sm:$0xff]  ;;  %v99_v28 = vld [vmem:[#allocation2 + $0x50] sm:$0xff]  ;;  %p897_p7 = por %p896_p6, %p895_p5 }
  0x50   :  { %723 = vmatprep.subr.bf16.mxu1 %v926_v0  ;;  %v709_v27 = vpack.c.bf16 %v98_v23, %v97_v22  ;;  %v100_v29 = vld [vmem:[#allocation2 + $0x58] sm:$0xff]  ;;  %v730_v30 = vpack.c.bf16 %v113_v26, %v112_v25  ;;  %v114_v31 = vld [vmem:[#allocation5 + $0x40] sm:$0xff]  ;;  %v115_v32 = vld [vmem:[#allocation5 + $0x48] sm:$0xff] }
  0x51   :  { %701 = vmatpush3.bf16.msra.mxu0 %v700_v7  ;;  %v712_v33 = vpack.c.bf16 %v100_v29, %v99_v28  ;;  %v101_v34 = vld [vmem:[#allocation2 + $0x60] sm:$0xff]  ;;  %v102_v35 = vld [vmem:[#allocation2 + $0x68] sm:$0xff]  ;;  %v733_v36 = vpack.c.bf16 %v115_v32, %v114_v31  ;;  %v116_v37 = vld [vmem:[#allocation5 + $0x50] sm:$0xff]  ;;  %p898_p8 = pnand %p897_p7, %p891_p4 }
  0x52   :  { %702 = vmatprep.subr.bf16.mxu0 %v926_v0  ;;  %v117_v38 = vld [vmem:[#allocation5 + $0x58] sm:$0xff]  ;;  %v715_v39 = vpack.c.bf16 %v102_v35, %v101_v34  ;;  %v103_v40 = vld [vmem:[#allocation2 + $0x70] sm:$0xff]  ;;  %v118_v43 = vld [vmem:[#allocation5 + $0x60] sm:$0xff] }
  0x53   :  { %725 = vmatpush3.bf16.msra.mxu1 %v724_v18  ;;  %v104_v41 = vld [vmem:[#allocation2 + $0x78] sm:$0xff]  ;;  %v736_v42 = vpack.c.bf16 %v117_v38, %v116_v37  ;;  %v119_v44 = vld [vmem:[#allocation5 + $0x68] sm:$0xff]  ;;  %v88_v47 = vld [vmem:[%s1121_s0] sm:$0x3] }
  0x54   :  { %726 = vmatprep.subr.bf16.mxu1 %v926_v0  ;;  %v718_v45 = vpack.c.bf16 %v104_v41, %v103_v40  ;;  %v739_v46 = vpack.c.bf16 %v119_v44, %v118_v43  ;;  %v120_v48 = vld [vmem:[#allocation5 + $0x70] sm:$0xff]  ;;  %v121_v49 = vld [vmem:[#allocation5 + $0x78] sm:$0xff]  ;;  %v123_v51 = vld [vmem:[#allocation7] sm:$0xff] }
  0x55   :  { %704 = vmatpush3.bf16.msra.mxu0 %v703_v14  ;;  %v742_v50 = vpack.c.bf16 %v121_v49, %v120_v48  ;;  %v124_v52 = vld [vmem:[#allocation7 + $0x8] sm:$0xff]  ;;  %v125_v53 = vld [vmem:[#allocation7 + $0x10] sm:$0xff]  ;;  %v126_v55 = vld [vmem:[#allocation7 + $0x18] sm:$0xff] }
  0x56   :  { %705 = vmatprep.subr.bf16.mxu0 %v926_v0  ;;  %v745_v54 = vpack.c.bf16 %v124_v52, %v123_v51  ;;  %v748_v56 = vpack.c.bf16 %v126_v55, %v125_v53  ;;  %v127_v57 = vld [vmem:[#allocation7 + $0x20] sm:$0xff]  ;;  %v128_v58 = vld [vmem:[#allocation7 + $0x28] sm:$0xff]  ;;  %v129_v60 = vld [vmem:[#allocation7 + $0x30] sm:$0xff] }
  0x57   :  { %728 = vmatpush3.bf16.msra.mxu1 %v727_v24  ;;  %v751_v59 = vpack.c.bf16 %v128_v58, %v127_v57  ;;  %v130_v61 = vld [vmem:[#allocation7 + $0x38] sm:$0xff]  ;;  %v131_v63 = vld [vmem:[#allocation7 + $0x40] sm:$0xff]  ;;  %v132_v2 = vld [vmem:[#allocation7 + $0x48] sm:$0xff] }
  0x58   :  { %729 = vmatprep.subr.bf16.mxu1 %v926_v0  ;;  %v754_v62 = vpack.c.bf16 %v130_v61, %v129_v60  ;;  %v757_v3 = vpack.c.bf16 %v132_v2, %v131_v63  ;;  %v133_v4 = vld [vmem:[#allocation7 + $0x50] sm:$0xff]  ;;  %v134_v5 = vld [vmem:[#allocation7 + $0x58] sm:$0xff]  ;;  %v484_v7 = vld [vmem:[%s1123_s2] ss:$0 sm:$0xff] }
  0x59   :  { %707 = vmatpush3.bf16.msra.mxu0 %v706_v21  ;;  %v760_v6 = vpack.c.bf16 %v134_v5, %v133_v4  ;;  %v135_v12 = vld [vmem:[#allocation7 + $0x60] sm:$0xff]  ;;  %v136_v13 = vld [vmem:[#allocation7 + $0x68] sm:$0xff]  ;;  %v137_v15 = vld [vmem:[#allocation7 + $0x70] sm:$0xff] }
  0x5a   :  { %708 = vmatprep.subr.bf16.mxu0 %v926_v0  ;;  %v763_v14 = vpack.c.bf16 %v136_v13, %v135_v12  ;;  %v138_v16 = vld [vmem:[#allocation7 + $0x78] sm:$0xff]  ;;  %v140_v18 = vld [vmem:[#allocation8] sm:$0xff]  ;;  %v141_v19 = vld [vmem:[#allocation8 + $0x8] sm:$0xff] }
  0x5b   :  { %731 = vmatpush3.bf16.msra.mxu1 %v730_v30  ;;  %v766_v17 = vpack.c.bf16 %v138_v16, %v137_v15  ;;  %v142_v20 = vld [vmem:[#allocation8 + $0x10] sm:$0xff]  ;;  %v769_v21 = vpack.c.bf16 %v141_v19, %v140_v18  ;;  %v143_v22 = vld [vmem:[#allocation8 + $0x18] sm:$0xff]  ;;  %v145_v24 = vld [vmem:[#allocation8 + $0x28] sm:$0xff] }
  0x5c   :  { %732 = vmatprep.subr.bf16.mxu1 %v926_v0  ;;  %v772_v23 = vpack.c.bf16 %v143_v22, %v142_v20  ;;  %v146_v26 = vld [vmem:[#allocation8 + $0x30] sm:$0xff]  ;;  %v148_v29 = vld [vmem:[#allocation8 + $0x40] sm:$0xff]  ;;  %v149_v30 = vld [vmem:[#allocation8 + $0x48] sm:$0xff] }
  0x5d   :  { %710 = vmatpush3.bf16.msra.mxu0 %v709_v27  ;;  %v147_v27 = vld [vmem:[#allocation8 + $0x38] sm:$0xff]  ;;  %v781_v31 = vpack.c.bf16 %v149_v30, %v148_v29  ;;  %v150_v32 = vld [vmem:[#allocation8 + $0x50] sm:$0xff]  ;;  %v485_v35 = vld [vmem:[%s1125_s4] ss:$0 sm:$0xff] }
  0x5e   :  { %711 = vmatprep.subr.bf16.mxu0 %v926_v0  ;;  %v778_v28 = vpack.c.bf16 %v147_v27, %v146_v26  ;;  %v152_v41 = vld [vmem:[#allocation8 + $0x60] sm:$0xff]  ;;  %v154_v44 = vld [vmem:[#allocation8 + $0x70] sm:$0xff] }
  0x5f   :  { %734 = vmatpush3.bf16.msra.mxu1 %v733_v36  ;;  %v487_v53 = vld [vmem:[%s1129_s8] ss:$0 sm:$0xff] }
  0x60   :  { %735 = vmatprep.subr.bf16.mxu1 %v926_v0 }
  0x61   :  { %713 = vmatpush3.bf16.msra.mxu0 %v712_v33  ;;  %v151_v33 = vld [vmem:[#allocation8 + $0x58] sm:$0xff] }
  0x62   :  { %714 = vmatprep.subr.bf16.mxu0 %v926_v0  ;;  %v784_v34 = vpack.c.bf16 %v151_v33, %v150_v32 }
  0x63   :  { %737 = vmatpush3.bf16.msra.mxu1 %v736_v42  ;;  %v153_v42 = vld [vmem:[#allocation8 + $0x68] sm:$0xff] }
  0x64   :  { %738 = vmatprep.subr.bf16.mxu1 %v926_v0  ;;  %v787_v43 = vpack.c.bf16 %v153_v42, %v152_v41 }
  0x65   :  { %716 = vmatpush3.bf16.msra.mxu0 %v715_v39 }
  0x66   :  { %717 = vmatprep.subr.bf16.mxu0 %v926_v0 }
  0x67   :  { %740 = vmatpush3.bf16.msra.mxu1 %v739_v46 }
  0x68   :  { %741 = vmatprep.subr.bf16.mxu1 %v926_v0 }
  0x69   :  { %719 = vmatpush3.bf16.msra.mxu0 %v718_v45  ;;  %v155_v45 = vld [vmem:[#allocation8 + $0x78] sm:$0xff] }
  0x6a   :  { %744 = vmatprep.subr.bf16.mxu0 %v926_v0  ;;  %v790_v46 = vpack.c.bf16 %v155_v45, %v154_v44 }
  0x6b   :  { %743 = vmatpush3.bf16.msra.mxu1 %v742_v50 }
  0x6c   :  { %589 = vmatmul.mubr.f32.vlgmr.msra.gmra.mrb[0].mxu0 %v88_v47  ;;  %768 = vmatprep.subr.bf16.mxu1 %v926_v0  ;;  %v486_v47 = vld [vmem:[%s1127_s6] ss:$0 sm:$0xff] }
  0x6d   :  { %658 = vmatprep.mubr.msk.f32.mxu0 %vm927_vm0, %v928_v1  ;;  %746 = vmatpush3.bf16.msra.mxu0 %v745_v54 }
  0x6e   :  { %747 = vmatprep.subr.bf16.mxu0 %v926_v0 }
  0x71   :  { %749 = vmatpush3.bf16.msra.mxu0 %v748_v56 }
  0x72   :  { %750 = vmatprep.subr.bf16.mxu0 %v926_v0 }
  0x75   :  { %752 = vmatpush3.bf16.msra.mxu0 %v751_v59 }
  0x76   :  { %753 = vmatprep.subr.bf16.mxu0 %v926_v0 }
  0x79   :  { %755 = vmatpush3.bf16.msra.mxu0 %v754_v62 }
  0x7a   :  { %756 = vmatprep.subr.bf16.mxu0 %v926_v0 }
  0x7d   :  { %758 = vmatpush3.bf16.msra.mxu0 %v757_v3 }
  0x7e   :  { %759 = vmatprep.subr.bf16.mxu0 %v926_v0 }
  0x81   :  { %761 = vmatpush3.bf16.msra.mxu0 %v760_v6 }
  0x82   :  { %762 = vmatprep.subr.bf16.mxu0 %v926_v0 }
  0x85   :  { %764 = vmatpush3.bf16.msra.mxu0 %v763_v14 }
  0x86   :  { %765 = vmatprep.subr.bf16.mxu0 %v926_v0 }
  0x89   :  { %767 = vmatpush3.bf16.msra.mxu0 %v766_v17 }
 0x13f   :  { %v229_v8 = vpop.f32.mrb[0].mxu0 }
 0x140   :  { %v230_v9 = vadd.f32 %v484_v7, %v229_v8  ;;  %v590_v10 = vpop.f32.mrb[1].mxu0 }
 0x142   :  { %v233_v11 = vmax.f32 %v230_v9, 0.0 }
 0x144   :  { %624 = vmatmul.mubr.f32.vlgmr.msra.gmra.mrb[0].mxu1 %v233_v11 }
 0x145   :  { %693 = vmatprep.mubr.msk.f32.mxu1 %vm927_vm0, %v928_v1  ;;  %770 = vmatpush3.bf16.msra.mxu1 %v769_v21  ;;  %v144_v1 = vld [vmem:[#allocation8 + $0x20] sm:$0xff] }
 0x146   :  { %771 = vmatprep.subr.bf16.mxu1 %v926_v0  ;;  %v775_v25 = vpack.c.bf16 %v145_v24, %v144_v1 }
 0x149   :  { %773 = vmatpush3.bf16.msra.mxu1 %v772_v23 }
 0x14a   :  { %774 = vmatprep.subr.bf16.mxu1 %v926_v0 }
 0x14d   :  { %776 = vmatpush3.bf16.msra.mxu1 %v775_v25 }
 0x14e   :  { %777 = vmatprep.subr.bf16.mxu1 %v926_v0 }
 0x151   :  { %779 = vmatpush3.bf16.msra.mxu1 %v778_v28 }
 0x152   :  { %780 = vmatprep.subr.bf16.mxu1 %v926_v0 }
 0x155   :  { %782 = vmatpush3.bf16.msra.mxu1 %v781_v31 }
 0x156   :  { %783 = vmatprep.subr.bf16.mxu1 %v926_v0 }
 0x159   :  { %785 = vmatpush3.bf16.msra.mxu1 %v784_v34 }
 0x15a   :  { %786 = vmatprep.subr.bf16.mxu1 %v926_v0 }
 0x15d   :  { %788 = vmatpush3.bf16.msra.mxu1 %v787_v43 }
 0x15e   :  { %789 = vmatprep.subr.bf16.mxu1 %v926_v0 }
 0x161   :  { %791 = vmatpush3.bf16.msra.mxu1 %v790_v46 }
 0x217   :  { %v306_v36 = vpop.f32.mrb[0].mxu1 }
 0x218   :  { %v307_v37 = vadd.f32 %v485_v35, %v306_v36  ;;  %v625_v38 = vpop.f32.mrb[1].mxu1 }
 0x21a   :  { %v310_v39 = vmax.f32 %v307_v37, 0.0 }
 0x21c   :  { %v311_v40 = vadd.f32 %v310_v39, %v233_v11 }
 0x21e   :  { %659 = vmatmul.mubr.f32.vlgmr.msra.gmra.mrb[2].mxu0 %v311_v40 }
 0x2f1   :  { %v384_v48 = vpop.f32.mrb[2].mxu0 }
 0x2f2   :  { %v385_v49 = vadd.f32 %v486_v47, %v384_v48  ;;  %v660_v50 = vpop.f32.mrb[3].mxu0 }
 0x2f4   :  { %v388_v51 = vmax.f32 %v385_v49, 0.0 }
 0x2f6   :  { %v389_v52 = vadd.f32 %v388_v51, %v311_v40 }
 0x2f8   :  { %694 = vmatmul.mubr.f32.vlgmr.msra.gmra.mrb[2].mxu1 %v389_v52 }
 0x3cb   :  { %v462_v0 = vpop.f32.mrb[2].mxu1 }
 0x3cc   :  { %v463_v54 = vadd.f32 %v487_v53, %v462_v0  ;;  %v695_v55 = vpop.f32.mrb[3].mxu1 }
 0x3ce   :  { %466 = vst [vmem:[#allocation10] sm:$0x3] %v463_v54 }
 0x3cf   :  { %901 = shalt.err (!%p898_p8)
}
 0x3d0   :  { %s902_s26 = scalar_lea.hbm %s1130_s9, 32 }
 0x3d1   :  { %p903_p9 = scmp.ne.s32.totalorder %s1130_s9, %s902_s26  ;;  %p906_p10 = scmp.lt.u32.totalorder %s902_s26, %s1130_s9 }
 0x3d3   :  { %p908_p11 = pnand %p906_p10, %p903_p9 }
 0x3d5   :  { %911 = shalt.err (!%p908_p11)
}
 0x3d6   :  { %476 = dma.vmem_to_hbm [thread:$0]  %s474_s23, 32, %s1130_s9, [#allocation4]  }
 0x3d7   :  { %918 = dma.done.wait [#allocation4], 32  }
 0x3d8   :  { %919 = vsyncadd [#allocation4], 4294967264 }
 0x3d9   :  { %480 = vsyncpa [#allocation3], 1 }
 0x3da   :  { %481 = vsyncpa [#allocation6], 1 }
 0x3db   :  { %482 = vsyncpa [#allocation9], 1 }
 0x3dc   :  { %483 = vsyncpa [#allocation4], 1 }

</bundles_post_ra>
